<compile_context>
chip_gen: v7x
topology: tpu7x:2x2x1
jax: 0.10.0
libtpu: 0.0.40
codegen_flags: <defaults>
</compile_context>

<pallas_src>
import math

import jax
import jax.numpy as jnp
from jax.experimental import pallas as pl
from jax.experimental.pallas import tpu as pltpu


def _round_up(x, m):
    return (x + m - 1) // m * m


# -----------------------------------------------------------------------------
# Kernel: one grid step = (batch tile i, layer l).
# o_ref doubles as the resident activation buffer across the layer axis.
# -----------------------------------------------------------------------------
def _dense_stack_kernel(x_ref, w_ref, b_ref, o_ref):
    l = pl.program_id(1)

    @pl.when(l == 0)
    def _():
        o_ref[...] = x_ref[...]

    x = o_ref[...]                      # (tm, D) activation, resident in VMEM
    w = w_ref[0]                        # (D, 2D) [value | gate] weights (bf16)
    b = b_ref[0]                        # (1, 2D) [value | gate] biases (f32)

    # Single wide MXU dot; cast activations to the weight dtype (bf16) only
    # for the matmul, accumulate in f32.
    x_mx = x if x.dtype == w.dtype else x.astype(w.dtype)
    y = jnp.dot(x_mx, w, preferred_element_type=jnp.float32) + b

    d = o_ref.shape[-1]
    value = y[:, :d]
    # sigmoid(z) == 0.5*(tanh(z/2)+1): one EUP push per vreg, no true divide.
    gate = 0.5 * (jnp.tanh(0.5 * y[:, d:]) + 1.0)
    o_ref[...] = (value * gate).astype(o_ref.dtype)


# -----------------------------------------------------------------------------
# Parameter construction (mirrors torch.nn.Linear sizing of the Dense module)
# -----------------------------------------------------------------------------
def make_dense_params(key, input_size, output_size, n_layers, dtype=jnp.float32):
    ratio = output_size / input_size
    sizes = []
    intermediate = input_size
    for i in range(n_layers):
        nxt = int(input_size * ratio ** ((i + 1) / n_layers))
        if i == n_layers - 1:
            nxt = output_size
        sizes.append((intermediate, nxt))
        intermediate = nxt

    params = []
    for (fan_in, fan_out) in sizes:
        key, k1, k2, k3, k4 = jax.random.split(key, 5)
        bound = 1.0 / math.sqrt(fan_in)
        # stored pre-transposed: (in, out), so y = x @ W + b
        w = jax.random.uniform(k1, (fan_in, fan_out), dtype, -bound, bound)
        b = jax.random.uniform(k2, (1, fan_out), dtype, -bound, bound)
        wg = jax.random.uniform(k3, (fan_in, fan_out), dtype, -bound, bound)
        bg = jax.random.uniform(k4, (1, fan_out), dtype, -bound, bound)
        params.append((w, b, wg, bg))
    return params, sizes


def pack_dense_params(params, *, lane=128, weight_dtype=None):
    """Pad every layer to a common lane-aligned width D, concatenate value/gate
    weights along N, and stack over layers.

    Returns:
      w_all: (L, D, 2D)   [:, :, :D] = value weights, [:, :, D:] = gate weights
      b_all: (L, 1, 2D)   f32 biases, same split
      d:     padded feature width D
    """
    dims = []
    for (w, _, _, _) in params:
        dims += [w.shape[0], w.shape[1]]
    d = _round_up(max(dims), lane)

    w_list, b_list = [], []
    for (w, b, wg, bg) in params:
        k, n = w.shape
        wdt = weight_dtype or w.dtype
        wp = jnp.zeros((d, 2 * d), wdt)
        wp = wp.at[:k, :n].set(w.astype(wdt))
        wp = wp.at[:k, d:d + n].set(wg.astype(wdt))
        bp = jnp.zeros((1, 2 * d), jnp.float32)
        bp = bp.at[0, :n].set(b.reshape(-1).astype(jnp.float32))
        bp = bp.at[0, d:d + n].set(bg.reshape(-1).astype(jnp.float32))
        w_list.append(wp)
        b_list.append(bp)
    return jnp.stack(w_list), jnp.stack(b_list), d


# -----------------------------------------------------------------------------
# Generation-aware VMEM budget / TensorCore count
# -----------------------------------------------------------------------------
def _tpu_generation_info():
    """Return (vmem_capacity_bytes, tensorcores_per_chip) with safe fallbacks."""
    kind = ""
    try:
        kind = jax.devices()[0].device_kind.lower()
    except Exception:
        pass

    vmem_cap = None
    try:
        vmem_cap = int(pltpu.get_tpu_info().vmem_capacity_bytes)
    except Exception:
        vmem_cap = None
    if not vmem_cap or vmem_cap <= 0:
        if "v7" in kind:
            vmem_cap = 64 << 20       # v7x: 64 MiB per TensorCore
        elif kind:
            vmem_cap = 128 << 20      # v5e / v6e
        else:
            vmem_cap = 64 << 20       # unknown: be conservative

    cores = 2 if "v7" in kind else 1  # v7x has 2 TCs/chip; v5e/v6e have 1
    return vmem_cap, cores


# -----------------------------------------------------------------------------
# VMEM accounting + tile sizing
# -----------------------------------------------------------------------------
def _vmem_estimate(tm, d, act_bytes, w_bytes):
    return (2 * tm * d * act_bytes          # x tile, double-buffered
            + 2 * tm * d * act_bytes        # resident activation / output tile
            + 2 * tm * 2 * d * 4            # (tm, 2D) f32 matmul result + temps
            + 2 * d * 2 * d * w_bytes       # per-layer [value|gate] weights, 2 bufs
            + 2 * 2 * d * 4)                # per-layer biases, 2 bufs


def _choose_tm(m, d, *, num_cores, act_bytes, w_bytes, vmem_budget, max_tm=1024):
    m8 = _round_up(max(m, 1), 8)
    fixed = _vmem_estimate(0, d, act_bytes, w_bytes)
    per_row = _vmem_estimate(1, d, act_bytes, w_bytes) - fixed
    if vmem_budget > fixed:
        tm_fit = max(8, min(max_tm, (vmem_budget - fixed) // per_row))
    else:
        tm_fit = 8

    if num_cores > 1 and m8 > 8 * num_cores:
        # v7x: exactly one tile per TensorCore (more tiles only re-streams the
        # full weight stack from HBM per extra tile).
        target = -(-m8 // num_cores)
    else:
        # Single-TC chips: one big tile whenever it fits the VMEM budget.
        target = m8

    tm = min(tm_fit, target)
    # Round to clean MXU-pass / (8,128) boundaries: prefer rounding up (fewer
    # tiles -> weights streamed fewer times), fall back to rounding down.
    if tm >= 256:
        q = 256
    elif tm >= 128:
        q = 128
    else:
        q = 8
    up = _round_up(tm, q)
    tm = up if up <= tm_fit else max(8, (tm // q) * q)
    return int(max(8, tm))


# -----------------------------------------------------------------------------
# Forward pass: one fused pallas_call for the whole stack
# -----------------------------------------------------------------------------
def dense_forward(x, params, *, weight_dtype=jnp.bfloat16, max_tm=1024):
    m, k_in = x.shape
    out_features = params[-1][0].shape[1]

    w_all, b_all, d = pack_dense_params(params, weight_dtype=weight_dtype)
    num_layers = w_all.shape[0]

    vmem_cap, num_cores = _tpu_generation_info()
    vmem_budget = (vmem_cap * 3) // 4        # ~96 MiB on v5e/v6e, ~48 MiB on v7x

    act_bytes = jnp.dtype(x.dtype).itemsize
    w_bytes = jnp.dtype(w_all.dtype).itemsize
    tm = _choose_tm(m, d, num_cores=num_cores, act_bytes=act_bytes,
                    w_bytes=w_bytes, vmem_budget=vmem_budget, max_tm=max_tm)
    mp = _round_up(m, tm)

    est = _vmem_estimate(tm, d, act_bytes, w_bytes)
    if est > vmem_budget:
        # TODO(synk): N-tiled weight streaming (pairing value/gate column blocks)
        # is needed once the double-buffered (D, 2D) weight block approaches the
        # scoped-VMEM limit (very wide layers, especially on v7x's 64 MiB).
        raise ValueError(
            f"padded width D={d} needs ~{est >> 20} MiB VMEM > budget "
            f"{vmem_budget >> 20} MiB; wide-layer weight tiling not implemented")

    vmem_limit = int(max(vmem_budget, 32 << 20))

    # Zero-pad activations to (mp, d); padding is exact (see header comment).
    xp = jnp.zeros((mp, d), x.dtype).at[:m, :k_in].set(x)

    out = pl.pallas_call(
        _dense_stack_kernel,
        out_shape=jax.ShapeDtypeStruct((mp, d), x.dtype),
        grid_spec=pltpu.PrefetchScalarGridSpec(
            num_scalar_prefetch=0,
            grid=(mp // tm, num_layers),
            in_specs=[
                pl.BlockSpec((tm, d), lambda i, l: (i, 0)),           # x tile
                pl.BlockSpec((1, d, 2 * d), lambda i, l: (l, 0, 0)),  # layer weights
                pl.BlockSpec((1, 1, 2 * d), lambda i, l: (l, 0, 0)),  # layer biases
            ],
            out_specs=pl.BlockSpec((tm, d), lambda i, l: (i, 0)),     # activation/out
        ),
        compiler_params=pltpu.CompilerParams(
            dimension_semantics=("parallel", "arbitrary"),
            vmem_limit_bytes=vmem_limit,
        ),
    )(xp, w_all, b_all)

    return out[:m, :out_features]


def dense_forward_ref(x, params, weight_dtype=None):
    """Pure-JAX reference.  If weight_dtype is given, mimic the kernel's
    reduced-precision MXU path (cast inputs/weights, accumulate f32)."""
    for (w, b, wg, bg) in params:
        if weight_dtype is not None:
            xc = x.astype(weight_dtype)
            v1 = jnp.dot(xc, w.astype(weight_dtype),
                         preferred_element_type=jnp.float32) + b
            g = jnp.dot(xc, wg.astype(weight_dtype),
                        preferred_element_type=jnp.float32) + bg
        else:
            v1 = x @ w + b
            g = x @ wg + bg
        x = v1 * jax.nn.sigmoid(g)
    return x


if __name__ == "__main__":
    key = jax.random.PRNGKey(0)
    key, kx, kp = jax.random.split(key, 3)

    batch = 8
    input_size = 32
    output_size = 64
    n_layers = 3

    params, sizes = make_dense_params(kp, input_size, output_size, n_layers)
    x = jax.random.normal(kx, (batch, input_size), jnp.float32)

    out = jax.block_until_ready(dense_forward(x, params))   # bf16-MXU path

    ref_bf16 = dense_forward_ref(x, params, weight_dtype=jnp.bfloat16)
    ref_f32 = dense_forward_ref(x, params)

    assert out.shape == (batch, output_size), out.shape
    assert jnp.allclose(out, ref_bf16, atol=1e-3, rtol=1e-3), \
        "mismatch vs precision-matched (bf16 MXU) reference"
    assert jnp.allclose(out, ref_f32, atol=5e-2, rtol=5e-2), \
        "mismatch vs f32 reference"

    print("KERNEL_OK")
</pallas_src>

<mosaic_0001>
module attributes {stable_mosaic.version = 11 : i64} {
  func.func @_dense_stack_kernel(%arg0: i32, %arg1: i32, %arg2: memref<8x128xf32, #tpu.memory_space<vmem>>, %arg3: memref<1x128x256xbf16, #tpu.memory_space<vmem>>, %arg4: memref<1x1x256xf32, #tpu.memory_space<vmem>>, %arg5: memref<8x128xf32, #tpu.memory_space<vmem>>) attributes {dimension_semantics = [#tpu.dimension_semantics<parallel>, #tpu.dimension_semantics<arbitrary>], iteration_bounds = array<i64: 1, 3>, scalar_prefetch = 0 : i64, scratch_operands = 0 : i64, tpu.core_type = #tpu.core_type<tc>, window_params = [{transform_indices = @transform_0, window_bounds = array<i64: 8, 128>}, {transform_indices = @transform_1, window_bounds = array<i64: 1, 128, 256>}, {transform_indices = @transform_2, window_bounds = array<i64: 1, 1, 256>}, {transform_indices = @transform_3, window_bounds = array<i64: 8, 128>}]} {
    %c0_i32 = arith.constant 0 : i32
    %0 = arith.cmpi eq, %arg1, %c0_i32 : i32
    %1 = arith.extui %0 : i1 to i32
    %c0_i32_0 = arith.constant 0 : i32
    %2 = arith.cmpi ne, %1, %c0_i32_0 : i32
    scf.if %2 {
      %c0_13 = arith.constant 0 : index
      %c0_14 = arith.constant 0 : index
      %23 = vector.load %arg2[%c0_13, %c0_14] : memref<8x128xf32, #tpu.memory_space<vmem>>, vector<8x128xf32>
      %c0_15 = arith.constant 0 : index
      %c0_16 = arith.constant 0 : index
      %24 = vector.load %arg5[%c0_15, %c0_16] : memref<8x128xf32, #tpu.memory_space<vmem>>, vector<8x128xf32>
      tpu.vector_store %arg5[%c0_15, %c0_16], %23 {strides = array<i32>} : memref<8x128xf32, #tpu.memory_space<vmem>>, vector<8x128xf32>,
    } else {
    }
    %c0 = arith.constant 0 : index
    %c0_1 = arith.constant 0 : index
    %3 = vector.load %arg5[%c0, %c0_1] : memref<8x128xf32, #tpu.memory_space<vmem>>, vector<8x128xf32>
    %c0_2 = arith.constant 0 : index
    %c0_3 = arith.constant 0 : index
    %c0_4 = arith.constant 0 : index
    %4 = vector.load %arg3[%c0_2, %c0_3, %c0_4] : memref<1x128x256xbf16, #tpu.memory_space<vmem>>, vector<1x128x256xbf16>
    %5 = vector.shape_cast %4 : vector<1x128x256xbf16> to vector<128x256xbf16>
    %c0_5 = arith.constant 0 : index
    %c0_6 = arith.constant 0 : index
    %c0_7 = arith.constant 0 : index
    %6 = vector.load %arg4[%c0_5, %c0_6, %c0_7] : memref<1x1x256xf32, #tpu.memory_space<vmem>>, vector<1x1x256xf32>
    %7 = vector.shape_cast %6 : vector<1x1x256xf32> to vector<1x256xf32>
    %8 = arith.truncf %3 : vector<8x128xf32> to vector<8x128xbf16>
    %cst = arith.constant dense<0.000000e+00> : vector<8x256xf32>
    %9 = tpu.matmul %8, %5, %cst {dimension_numbers = #tpu.dot_dimension_numbers<[1], [0], [0], [1], [0, 0, 1, 1], [], []>} : vector<8x128xbf16>, vector<128x256xbf16>, vector<8x256xf32> -> vector<8x256xf32>
    %10 = vector.broadcast %7 : vector<1x256xf32> to vector<8x256xf32>
    %11 = arith.addf %9, %10 : vector<8x256xf32>
    %12 = vector.extract_strided_slice %11 {offsets = [0, 0], sizes = [8, 128], strides = [1, 1]} : vector<8x256xf32> to vector<8x128xf32>
    %13 = vector.extract_strided_slice %11 {offsets = [0, 128], sizes = [8, 128], strides = [1, 1]} : vector<8x256xf32> to vector<8x128xf32>
    %cst_8 = arith.constant 5.000000e-01 : f32
    %14 = vector.broadcast %cst_8 : f32 to vector<8x128xf32>
    %15 = arith.mulf %14, %13 : vector<8x128xf32>
    %16 = math.tanh %15 : vector<8x128xf32>
    %cst_9 = arith.constant 1.000000e+00 : f32
    %17 = vector.broadcast %cst_9 : f32 to vector<8x128xf32>
    %18 = arith.addf %16, %17 : vector<8x128xf32>
    %cst_10 = arith.constant 5.000000e-01 : f32
    %19 = vector.broadcast %cst_10 : f32 to vector<8x128xf32>
    %20 = arith.mulf %19, %18 : vector<8x128xf32>
    %21 = arith.mulf %12, %20 : vector<8x128xf32>
    %c0_11 = arith.constant 0 : index
    %c0_12 = arith.constant 0 : index
    %22 = vector.load %arg5[%c0_11, %c0_12] : memref<8x128xf32, #tpu.memory_space<vmem>>, vector<8x128xf32>
    tpu.vector_store %arg5[%c0_11, %c0_12], %21 {strides = array<i32>} : memref<8x128xf32, #tpu.memory_space<vmem>>, vector<8x128xf32>,
    return
  }
  func.func @transform_0(%arg0: i32, %arg1: i32) -> (i32, i32) {
    %c0_i32 = arith.constant 0 : i32
    %c0_i32_0 = arith.constant 0 : i32
    return %arg0, %c0_i32 : i32, i32
  }
  func.func @transform_1(%arg0: i32, %arg1: i32) -> (i32, i32, i32) {
    %c0_i32 = arith.constant 0 : i32
    %c0_i32_0 = arith.constant 0 : i32
    %c0_i32_1 = arith.constant 0 : i32
    return %arg1, %c0_i32, %c0_i32_0 : i32, i32, i32
  }
  func.func @transform_2(%arg0: i32, %arg1: i32) -> (i32, i32, i32) {
    %c0_i32 = arith.constant 0 : i32
    %c0_i32_0 = arith.constant 0 : i32
    %c0_i32_1 = arith.constant 0 : i32
    return %arg1, %c0_i32, %c0_i32_0 : i32, i32, i32
  }
  func.func @transform_3(%arg0: i32, %arg1: i32) -> (i32, i32) {
    %c0_i32 = arith.constant 0 : i32
    %c0_i32_0 = arith.constant 0 : i32
    return %arg0, %c0_i32 : i32, i32
  }
}

</mosaic_0001>

<bundles_post_ra>
// kernel: tpu_custom_call.1
= control target key start
LH: loop header
LB: loop body
LE: loop exit
PB: predicated region body
PF: predicated region fallthrough
CT: control target
= control target key end

     0   :  { %8 = vsyncpa [#allocation3], 0  ;;  %s1102_s0 = inlined_call_operand.hbm [shape: f32[8,128], index: 0, kind: input, shape index: {}]   ;;  %s1103_s1 = inlined_call_operand.hbm [shape: bf16[3,128,256], index: 1, kind: input, shape index: {}]   ;;  %s1104_s2 = inlined_call_operand.hbm [shape: f32[3,1,256], index: 2, kind: input, shape index: {}]   ;;  %s1105_s3 = inlined_call_operand.hbm [shape: f32[8,128], index: 3, kind: output, shape index: {}]  }
   0x1   :  { %9 = vsyncpa [#allocation6], 0 }
   0x2   :  { %11 = vsyncpa [#allocation6 + $0x1], 0 }
   0x3   :  { %12 = vsyncpa [#allocation4], 0  ;;  %s862_s12 = smov 0   ;;  %s864_s13 = smov 0  }
   0x4   :  { %s866_s14 = smov 0   ;;  %s868_s15 = smov 0  }
   0x5   :  { %s870_s16 = smov 0   ;;  %s872_s17 = smov 0  }
   0x6 LB: > { %s27_s18 = sadd.s32 1, %s829_s16  ;;  %s63_s19 = sadd.s32 1, %s821_s14  ;;  %s833_s17 = sphi %s872_s17, %s18_s17   ;;  %s829_s16 = sphi %s870_s16, %s1127_s16   ;;  %s825_s15 = sphi %s868_s15, %s1126_s15   ;;  %s821_s14 = sphi %s866_s14, %s1125_s14   ;;  %s817_s13 = sphi %s864_s13, %s1124_s13   ;;  %s813_s12 = sphi %s862_s12, %s1123_s12  }
   0x7   : > { %p28_p0 = scmp.ge.s32.totalorder %s27_s18, 3  ;;  %p70_p1 = scmp.ne.s32.totalorder %s821_s14, %s817_s13 }
   0x8   : > { %p71_p2 = scmp.eq.s32.totalorder %s833_s17, 0  ;;  %p578_p4 = scmp.lt.s32.totalorder %s833_s17, 3 }
   0x9   : > { %s1129_s18 = smov (%p28_p0, %s27_s18), 0  ;;  %s165_s21 = sand.u32 1, %s833_s17  }
   0xa   : > { %p72_p3 = por %p71_p2, %p70_p1  ;;  %s60_s20 = ssub.s32 %s829_s16, %s1129_s18 }
   0xb   : > { %p61_p5 = scmp.eq.s32.totalorder %s60_s20, 0  ;;  %s167_s22 = sand.u32 1, %s821_s14  }
   0xc   : > { %s552_s23 = sshll.u32 %s829_s16, 11  ;;  %s521_s25 = sshll.u32 %s167_s22, 7 }
   0xd   : > { %s906_s24 = scalar_select %p61_p5, %s821_s14, %s63_s19  }
   0xe   : > { %s913_s28 = scalar_lea.hbm %s1103_s1, %s552_s23  ;;  %p915_p6 = pnand %p578_p4, %p72_p3 }
   0xf   : > { %s169_s30 = scalar_lea.vmem [#allocation5], %s521_s25  ;;  %s921_s5 = scalar_lea.sflag [#allocation6], %s165_s21 }
  0x10   : > { %s1112_s29 = scalar_select %p915_p6, 1, 0 }
  0x11   : > { %s176_s4 = sshll.u32 %s169_s30, 4  ;;  %s661_s6 = scalar_lea.hbm %s913_s28, 2048  ;;  %s919_s4 = int_to_ptr.vmem [resolvable:$true] %s176_s4 }
  0x12   : > { %p662_p7 = scmp.ne.s32.totalorder %s913_s28, %s661_s6  ;;  %p1107_p8 = pneg %p915_p6 }
  0x13   : > { %s666_s9 = scalar_lea.hbm %s1103_s1, 6144  ;;  %p667_p11 = scmp.lt.u32.totalorder %s913_s28, %s1103_s1 }
  0x14   : > { %p664_p9 = pnand %p1107_p8, %p662_p7  ;;  %p668_p12 = scmp.lt.u32.totalorder %s666_s9, %s661_s6 }
  0x15   : > { %p670_p0 = scmp.lt.u32.totalorder %s661_s6, %s913_s28 }
  0x16   : > { %p665_p10 = pneg %p664_p9  ;;  %p669_p13 = por %p668_p12, %p667_p11 }
  0x18   : > { %p671_p1 = por %p670_p0, %p669_p13 }
  0x1a   : > { %p672_p2 = pnand %p671_p1, %p665_p10 }
  0x1c   : > { %675 = shalt.err (!%p672_p2)
}
  0x1d   : > { %s676_s19 = scalar_lea.vmem %s919_s4, 2048  ;;  %s835_s20 = smov [#allocation5]  }
  0x1e   : > { %p677_p3 = scmp.ne.s32.totalorder %s919_s4, %s676_s19  ;;  %s681_s21 = sshll.u32 %s835_s20, 4  ;;  %s682_s21 = int_to_ptr.vmem [resolvable:$false] %s681_s21 }
  0x1f   : > { %s683_s23 = scalar_lea.vmem %s682_s21, 4096  ;;  %p684_p7 = scmp.lt.s32.totalorder %s919_s4, %s682_s21 }
  0x20   : > { %p679_p4 = pnand %p677_p3, %p1107_p8  ;;  %p685_p9 = scmp.lt.s32.totalorder %s683_s23, %s676_s19 }
  0x22   : > { %p680_p5 = pneg %p679_p4  ;;  %p686_p11 = por %p685_p9, %p684_p7 }
  0x24   : > { %p687_p12 = pnand %p686_p11, %p680_p5 }
  0x26   : > { %690 = shalt.err (!%p687_p12)
}
  0x27   : > { %s836_s25 = smov 128   ;;  %s837_s26 = smov 8  }
  0x28   : > { %573 = dma.hbm_to_vmem [thread:$0]  (!%p915_p6), %s913_s28, 2048, %s919_s4, %s921_s5, %s836_s25, %s836_s25, %s837_s26  }
  0x29   : > { %s950_s27 = sadd.s32 4294967295, %s833_s17   ;;  %p76_p10 = scmp.ne.s32.totalorder %s817_s13, %s813_s12 }
  0x2a   : > { %p1106_p13 = scmp.eq.s32.totalorder %s950_s27, 0  ;;  %p518_p0 = scmp.ge.s32.totalorder %s833_s17, 1 }
  0x2b   : > { %p139_p1 = scmp.lt.s32.totalorder %s833_s17, 4  ;;  %s838_s28 = smov [#allocation2]  }
  0x2c   : > { %p959_p2 = por %p1106_p13, %p76_p10  ;;  %s154_s4 = sshll.u32 %s838_s28, 4  ;;  %s155_s4 = int_to_ptr.vmem [resolvable:$true] %s154_s4 }
  0x2d   : > { %p963_p3 = pnand %p518_p0, %p139_p1  ;;  %s524_s7 = sshll.u32 %s167_s22, 1 }
  0x2e   : > { %s1113_s30 = scalar_select %p959_p2, 1, 0 }
  0x2f   : > { %s1114_s6 = scalar_select %p963_p3, 1, 0 }
  0x30   : > { %p566_p4 = pneg %p963_p3  ;;  %s553_s12 = sshll.u32 %s829_s16, 5 }
  0x31   : > { %s981_s11 = scalar_lea.hbm %s1104_s2, %s553_s12  ;;  %s190_s19 = scalar_lea.vmem [#allocation7], %s524_s7 }
  0x32   : > { %p974_p5 = pnand %p566_p4, %p1106_p13  ;;  %s198_s20 = sshll.u32 %s190_s19, 4  ;;  %s983_s20 = int_to_ptr.vmem [resolvable:$true] %s198_s20 }
  0x33   : > { %s691_s23 = scalar_lea.hbm %s1102_s0, 128 }
  0x34   : > { %p692_p7 = scmp.ne.s32.totalorder %s1102_s0, %s691_s23  ;;  %p693_p9 = pneg %p974_p5 }
  0x35   : > { %p698_p10 = scmp.lt.u32.totalorder %s691_s23, %s1102_s0 }
  0x36   : > { %p694_p11 = pnand %p693_p9, %p692_p7 }
  0x38   : > { %p695_p12 = pneg %p694_p11 }
  0x3a   : > { %p700_p0 = pnand %p698_p10, %p695_p12 }
  0x3c   : > { %703 = shalt.err (!%p700_p0)
}
  0x3d   : > { %s704_s7 = scalar_lea.vmem %s155_s4, 128  ;;  %p712_p8 = scmp.lt.s32.totalorder %s155_s4, %s155_s4 }
  0x3e   : > { %p705_p1 = scmp.ne.s32.totalorder %s155_s4, %s704_s7  ;;  %p713_p2 = scmp.lt.s32.totalorder %s704_s7, %s704_s7 }
  0x40   : > { %p707_p4 = pnand %p705_p1, %p693_p9  ;;  %p714_p3 = por %p713_p2, %p712_p8 }
  0x42   : > { %p708_p13 = pneg %p707_p4 }
  0x44   : > { %p715_p6 = pnand %p714_p3, %p708_p13 }
  0x46   : > { %718 = shalt.err (!%p715_p6)
}
  0x47   : > { %569 = dma.hbm_to_vmem [thread:$0]  (!%p974_p5), %s1102_s0, 128, %s155_s4, [#allocation3]  }
  0x48   : > { %s719_s19 = scalar_lea.hbm %s981_s11, 32  ;;  %p1116_p9 = scmp.ne.s32.totalorder %s1112_s29, 0 }
  0x49   : > { %p720_p7 = scmp.ne.s32.totalorder %s981_s11, %s719_s19  ;;  %s724_s23 = scalar_lea.hbm %s1104_s2, 96 }
  0x4a   : > { %p1117_p11 = pneg %p1116_p9  ;;  %p725_p6 = scmp.lt.u32.totalorder %s981_s11, %s1104_s2 }
  0x4b   : > { %p726_p8 = scmp.lt.u32.totalorder %s724_s23, %s719_s19  ;;  %p728_p2 = scmp.lt.u32.totalorder %s719_s19, %s981_s11 }
  0x4c   : > { %p722_p12 = pnand %p720_p7, %p1117_p11 }
  0x4d   : > { %p727_p13 = por %p726_p8, %p725_p6 }
  0x4e   : > { %p723_p10 = pneg %p722_p12 }
  0x4f   : > { %p729_p3 = por %p728_p2, %p727_p13 }
  0x51   : > { %p730_p0 = pnand %p729_p3, %p723_p10 }
  0x53   : > { %733 = shalt.err (!%p730_p0)
}
  0x54   : > { %s734_s4 = scalar_lea.vmem %s983_s20, 32  ;;  %p1118_p1 = pmov %p1117_p11 }
  0x55   : > { %p735_p5 = scmp.ne.s32.totalorder %s983_s20, %s734_s4  ;;  %s839_s26 = smov [#allocation7]  }
  0x56   : > { %s739_s28 = sshll.u32 %s839_s26, 4  ;;  %s740_s28 = int_to_ptr.vmem [resolvable:$false] %s739_s28 }
  0x57   : > { %p737_p4 = pnand %p735_p5, %p1118_p1  ;;  %s741_s9 = scalar_lea.vmem %s740_s28, 64 }
  0x58   : > { %p742_p11 = scmp.lt.s32.totalorder %s983_s20, %s740_s28  ;;  %p743_p12 = scmp.lt.s32.totalorder %s741_s9, %s734_s4 }
  0x59   : > { %p738_p7 = pneg %p737_p4 }
  0x5a   : > { %p744_p6 = por %p743_p12, %p742_p11 }
  0x5c   : > { %p745_p8 = pnand %p744_p6, %p738_p7 }
  0x5e   : > { %748 = shalt.err (!%p745_p8)
}
  0x5f   : > { %576 = dma.hbm_to_vmem [thread:$0]  (!%p1116_p9), %s981_s11, 32, %s983_s20, %s921_s5  }
  0x60   : > { %p1119_p10 = scmp.ne.s32.totalorder %s1114_s6, 0 }
  0x61   : > { %p1120_p13 = scmp.eq.s32.totalorder (!%p1119_p10), %s950_s27, 0 }
  0x62   : > { %207 = sbr.rel (%p1119_p10) target bundleno = 402 (0x192), region = 32 }
  0x69   : > { %800 = dma.done.wait (%p1120_p13), [#allocation3], 128   ;;  %p1121_p2 = pmov %p1120_p13 }
  0x6a   : > { %s213_s7 = sand.u32 1, %s950_s27   ;;  %s215_s12 = sand.u32 1, %s817_s13  }
  0x6b   : > { %802 = vsyncadd (%p1121_p2), [#allocation3], 4294967168  ;;  %s529_s10 = sshll.u32 %s215_s12, 7  ;;  %s214_s29 = scalar_lea.sflag [#allocation6], %s213_s7 }
  0x6c   : > { %s1033_s19 = scalar_lea.vmem [#allocation5], %s529_s10  ;;  %p1122_p3 = scmp.ne.s32.totalorder %s1113_s30, 0 }
  0x6e   : > { %804 = dma.done.wait (%p1122_p3), %s214_s29, 2080  }
  0x6f   : > { %806 = vsyncadd (%p1122_p3), %s214_s29, 4294965216  ;;  %s1039_s5 = sshll.u32 %s215_s12, 1  ;;  %p531_p9 = scmp.ne.s32.totalorder %s825_s15, 0 }
  0x70   : > { %s226_s6 = scalar_lea.vmem [#allocation7], %s1039_s5  ;;  %v254_v0 = vld [vmem:[#allocation2] sm:$0xff] (!%p531_p9) }
  0x71   : > { %253 = sbr.rel (%p531_p9) target bundleno = 120 (0x78), region = 48  ;;  %255 = vst [vmem:[#allocation8] sm:$0xff] (!%p531_p9), %v254_v0 }
  0x78 PF: > { %v635_v1 = vld [vmem:[%s1033_s19 + $0x4] ss:$8 sps:$4 sm:$0xff]   ;;  %v637_v2 = vld [vmem:[%s1033_s19] ss:$8 sps:$4 sm:$0xff]   ;;  %v840_v3 = vmov 0   ;;  %v276_v20 = vlaneseq  ;;  %s841_s15 = smov [#allocation8]  }
  0x79   : > { %398 = vmatprep.mubr.bf16.mxu0 %v840_v3  ;;  %366 = vmatprep.subr.bf16.mxu0 %v635_v1  ;;  %v638_v4 = vld [vmem:[%s1033_s19 + $0x14] ss:$8 sps:$4 sm:$0xff]   ;;  %v640_v5 = vld [vmem:[%s1033_s19 + $0x10] ss:$8 sps:$4 sm:$0xff]   ;;  %v641_v6 = vld [vmem:[%s1033_s19 + $0x24] ss:$8 sps:$4 sm:$0xff]  }
  0x7a   : > { %367 = vmatpush1.bf16.msra.mxu0 %v637_v2  ;;  %v643_v7 = vld [vmem:[%s1033_s19 + $0x20] ss:$8 sps:$4 sm:$0xff]   ;;  %v644_v8 = vld [vmem:[%s1033_s19 + $0x34] ss:$8 sps:$4 sm:$0xff]   ;;  %v646_v9 = vld [vmem:[%s1033_s19 + $0x30] ss:$8 sps:$4 sm:$0xff]  }
  0x7b   : > { %368 = vmatprep.subr.bf16.mxu0 %v638_v4  ;;  %v647_v10 = vld [vmem:[%s1033_s19 + $0x44] ss:$8 sps:$4 sm:$0xff]   ;;  %v649_v11 = vld [vmem:[%s1033_s19 + $0x40] ss:$8 sps:$4 sm:$0xff]   ;;  %v650_v12 = vld [vmem:[%s1033_s19 + $0x54] ss:$8 sps:$4 sm:$0xff]  }
  0x7c   : > { %v652_v13 = vld [vmem:[%s1033_s19 + $0x50] ss:$8 sps:$4 sm:$0xff]   ;;  %v653_v14 = vld [vmem:[%s1033_s19 + $0x64] ss:$8 sps:$4 sm:$0xff]   ;;  %v655_v15 = vld [vmem:[%s1033_s19 + $0x60] ss:$8 sps:$4 sm:$0xff]  }
  0x7d   : > { %v656_v16 = vld [vmem:[%s1033_s19 + $0x74] ss:$8 sps:$4 sm:$0xff]   ;;  %v658_v17 = vld [vmem:[%s1033_s19 + $0x70] ss:$8 sps:$4 sm:$0xff]   ;;  %v256_v18 = vld [vmem:[#allocation8] sm:$0xff]  ;;  %v277_v21 = vshrl.u32 %v276_v20, 7 }
  0x7e   : > { %369 = vmatpush1.bf16.msra.mxu0 %v640_v5  ;;  %v274_v19 = vpack.c.bf16 %v256_v18, %v256_v18  ;;  %v273_v23 = vld [vmem:[%s226_s6] sm:$0x3]  ;;  %s422_s30 = sshll.u32 %s841_s15, 4  ;;  %p580_p0 = scmp.eq.s32.totalorder %s950_s27, 2  ;;  %s423_s30 = int_to_ptr.vmem [resolvable:$true] %s422_s30 }
  0x7f   : > { %370 = vmatprep.subr.bf16.mxu0 %v641_v6  ;;  %v282_v22 = vsub.s32 1, %v277_v21  ;;  %v278_v31 = vsub.s32 0, %v277_v21  ;;  %s749_s11 = scalar_lea.vmem %s423_s30, 128  ;;  %p756_p7 = scmp.lt.s32.totalorder %s423_s30, %s423_s30 }
  0x80   : > { %p750_p5 = scmp.ne.s32.totalorder %s423_s30, %s749_s11  ;;  %p757_p11 = scmp.lt.s32.totalorder %s749_s11, %s749_s11 }
  0x81   : > { %v283_v24 = vrot.slane %v273_v23, %v282_v22  ;;  %v279_v32 = vrot.slane %v273_v23, %v278_v31 }
  0x82   : > { %371 = vmatpush1.bf16.msra.mxu0 %v643_v7  ;;  %p751_p1 = pnand %p750_p5, %p580_p0  ;;  %p758_p12 = por %p757_p11, %p756_p7 }
  0x83   : > { %372 = vmatprep.subr.bf16.mxu0 %v644_v8 }
  0x84   : > { %p752_p4 = pneg %p751_p1 }
  0x86   : > { %373 = vmatpush1.bf16.msra.mxu0 %v646_v9  ;;  %p759_p6 = pnand %p758_p12, %p752_p4 }
  0x87   : > { %374 = vmatprep.subr.bf16.mxu0 %v647_v10 }
  0x8a   : > { %375 = vmatpush1.bf16.msra.mxu0 %v649_v11 }
  0x8b   : > { %376 = vmatprep.subr.bf16.mxu0 %v650_v12 }
  0x8e   : > { %377 = vmatpush1.bf16.msra.mxu0 %v652_v13 }
  0x8f   : > { %378 = vmatprep.subr.bf16.mxu0 %v653_v14 }
  0x92   : > { %379 = vmatpush1.bf16.msra.mxu0 %v655_v15 }
  0x93   : > { %380 = vmatprep.subr.bf16.mxu0 %v656_v16 }
  0x96   : > { %381 = vmatpush1.bf16.msra.mxu0 %v658_v17 }
  0x99   : > { %399 = vmatmul.mubr.bf16.vlgmr.msra.gmra.mrb[0].mxu0 %v274_v19 }
 0x16c   : > { %v400_v25 = vpop.f32.mrb[0].mxu0 }
 0x16d   : > { %v402_v26 = vpop.f32.mrb[1].mxu0  ;;  %v401_v35 = vadd.f32 %v400_v25, %v279_v32 }
 0x16e   : > { %v403_v27 = vadd.f32 %v402_v26, %v283_v24  ;;  %v404_v28 = vpop.f32.mrb[2].mxu0 }
 0x16f   : > { %v405_v29 = vpop.f32.mrb[3].mxu0 }
 0x170   : > { %v407_v30 = vmul.f32 0.5, %v403_v27 }
 0x172   : > { %659 = vtanh.f32 %v407_v30 }
 0x17c   : > { %v660_v33 = vpop.eup %659 }
 0x17d   : > { %v409_v34 = vadd.f32 1.0, %v660_v33 }
 0x17f   : > { %v410_v36 = vmul.f32 0.5, %v409_v34 }
 0x181   : > { %v411_v37 = vmul.f32 %v410_v36, %v401_v35 }
 0x183   : > { %412 = vst [vmem:[#allocation8] sm:$0xff] %v411_v37 }
 0x184   : > { %762 = shalt.err (!%p759_p6)
}
 0x185   : > { %s763_s21 = scalar_lea.hbm %s1105_s3, 128 }
 0x186   : > { %p764_p8 = scmp.ne.s32.totalorder %s1105_s3, %s763_s21  ;;  %p769_p2 = scmp.lt.u32.totalorder %s763_s21, %s1105_s3 }
 0x188   : > { %p765_p10 = pnand %p764_p8, %p580_p0 }
 0x18a   : > { %p766_p13 = pneg %p765_p10 }
 0x18c   : > { %p771_p3 = pnand %p769_p2, %p766_p13 }
 0x18e   : > { %774 = shalt.err (!%p771_p3)
}
 0x18f   : > { %563 = dma.vmem_to_hbm [thread:$0]  (%p580_p0), %s423_s30, 128, %s1105_s3, [#allocation4]  }
 0x190   : > { %808 = dma.done.wait (%p580_p0), [#allocation4], 128  }
 0x191   : > { %810 = vsyncadd (%p580_p0), [#allocation4], 4294967168 }
 0x192 PF: > { %s18_s17 = sadd.s32 1, %s833_s17   ;;  %s1123_s12 = smov %s817_s13 }
 0x193   : > { %p15_p9 = scmp.ge.s32.totalorder %s18_s17, 5   ;;  %s1124_s13 = smov %s821_s14 }
 0x194   : > { %s1125_s14 = smov %s906_s24  ;;  %s1126_s15 = smov %s829_s16 }
 0x195   : > { %s1127_s16 = smov %s1129_s18  ;;  %17 = sbr.rel (!%p15_p9) target bundleno = 6 (0x6), region = 91 }
 0x19c   :  { %435 = vsyncpa [#allocation3], 1 }
 0x19d   :  { %437 = vsyncpa [#allocation3 + $0x1], 1 }
 0x19e   :  { %438 = vsyncpa [#allocation6], 1 }
 0x19f   :  { %440 = vsyncpa [#allocation6 + $0x1], 1 }
 0x1a0   :  { %441 = vsyncpa [#allocation4], 1 }
 0x1a1   :  { %443 = vsyncpa [#allocation4 + $0x1], 1 }

</bundles_post_ra>
